<compile_context>
chip_gen: v5e
topology: v5e:2x2
jax: 0.10.0
libtpu: 0.0.40
codegen_flags: <defaults>
</compile_context>

<pallas_src>
import functools

import jax
import jax.numpy as jnp
import numpy as np
from jax.experimental import pallas as pl
from jax.experimental.pallas import tpu as pltpu


# ---------------------------------------------------------------------------
# In-kernel helpers
# ---------------------------------------------------------------------------
def _shifted_rows(x2d, h):
    """Rows h-1 / h+1 of every image for a flat (N*H, K) slab.

    Image-boundary rows are zeroed with a mask built from a 2-D iota, so no
    (N, H, K) reshape round-trip is needed.
    """
    rows, k = x2d.shape
    row = jax.lax.broadcasted_iota(jnp.int32, (rows, k), 0)
    zrow = jnp.zeros((1, k), x2d.dtype)
    x_up = jnp.concatenate([zrow, x2d[:rows - 1, :]], axis=0)
    x_up = jnp.where(row % h == 0, 0.0, x_up)          # first row of each image
    x_dn = jnp.concatenate([x2d[1:, :], zrow], axis=0)
    x_dn = jnp.where(row % h == h - 1, 0.0, x_dn)      # last row of each image
    return x_up, x_dn


def _conv3x3_rows(x2d, t_ref, *, h, mm_dtype):
    """3x3 conv (stride 1, padding 1) on a (N*H, W*Cin) slab as ONE matmul.

    t_ref : (3*W*Cin, W*Cout) dy-merged banded weight matrix (dx taps and the
            width zero-padding folded in).  Returns f32 (N*H, W*Cout), no bias.
    """
    x_up, x_dn = _shifted_rows(x2d, h)
    # Cast ONCE per layer, right before the single MXU matmul (f32 acc).
    xk = jnp.concatenate([x_up, x2d, x_dn], axis=-1).astype(mm_dtype)
    return jnp.dot(xk, t_ref[...], preferred_element_type=jnp.float32)


def _bn_relu(acc, gamma, beta_row, fold, fold_t, *, m, eps):
    """Training-mode BatchNorm (batch stats, biased var, two-pass) + ReLU.

    acc      : (rows, W*C) f32 conv-output slab (rows == N*H).
    gamma    : (1, C) BN weight.
    beta_row : (1, W*C) BN bias pre-tiled to the lane-interleaved layout.
    fold     : (W*C, C) 0/1 channel-fold matrix; fold_t its transpose.
    """
    col_sum = jnp.sum(acc, axis=0, keepdims=True)                        # (1, W*C)
    mean = jnp.dot(col_sum, fold, preferred_element_type=jnp.float32) / m     # (1, C)
    mean_row = jnp.dot(mean, fold_t, preferred_element_type=jnp.float32)      # (1, W*C)
    centered = acc - mean_row
    col_ss = jnp.sum(centered * centered, axis=0, keepdims=True)         # (1, W*C)
    var = jnp.dot(col_ss, fold, preferred_element_type=jnp.float32) / m       # (1, C)
    scale = gamma * jax.lax.rsqrt(var + eps)                             # (1, C)
    scale_row = jnp.dot(scale, fold_t, preferred_element_type=jnp.float32)    # (1, W*C)
    return jnp.maximum(centered * scale_row + beta_row, 0.0)


def _conv_block_kernel(x_ref, t1_ref, t2_ref, fold_ref, foldt_ref,
                       g1_ref, bt1_ref, g2_ref, bt2_ref, o_ref,
                       *, h, w, eps, mm_dtype):
    """Fused Conv3x3+BN+ReLU x2.  All slabs are lane-dense (rows, W*channels)."""
    x = x_ref[...]                                          # (N*H, W*Cin) f32
    fold = fold_ref[...]
    fold_t = foldt_ref[...]
    m = float(x.shape[0] * w)                               # elements per channel

    a1 = _conv3x3_rows(x, t1_ref, h=h, mm_dtype=mm_dtype)
    h1 = _bn_relu(a1, g1_ref[...], bt1_ref[...], fold, fold_t, m=m, eps=eps)
    a2 = _conv3x3_rows(h1, t2_ref, h=h, mm_dtype=mm_dtype)
    y = _bn_relu(a2, g2_ref[...], bt2_ref[...], fold, fold_t, m=m, eps=eps)
    o_ref[...] = y.astype(o_ref.dtype)                      # (N*H, W*Cout): 128 lanes


# ---------------------------------------------------------------------------
# Wrapper-side weight preprocessing (layout plumbing, done outside the kernel)
# ---------------------------------------------------------------------------
def _row_toeplitz_dy_merged(w_hwio, width):
    """Fold dx taps + width zero-padding of a 3x3 conv into ONE dy-merged banded matrix.

    w_hwio: (3, 3, cin, cout)  ->  (3*width*cin, width*cout) such that
        conv3x3(x, pad=1)[n, h] == concat(x_row(h-1), x_row(h), x_row(h+1)) @ T
    where x_row is the (width*cin,) row slab (channels fastest) and rows
    outside [0, H) are zero.
    """
    kh, kw, cin, cout = w_hwio.shape
    mats = []
    for dy in range(kh):
        t = jnp.zeros((width * cin, width * cout), w_hwio.dtype)
        for dx in range(kw):
            # S[w_in, w] = 1  iff  w_in == w + dx - 1   (padding = 1)
            sel = jnp.eye(width, width, k=1 - dx, dtype=w_hwio.dtype)
            t = t + jnp.kron(sel, w_hwio[dy, dx])
        mats.append(t)
    return jnp.concatenate(mats, axis=0)                    # (3*W*Cin, W*Cout)


def conv_block_forward(params, x_nchw, *, eps=1e-5, matmul_dtype=jnp.bfloat16):
    """Equivalent of ConvBlock.forward (training mode). NCHW in / NCHW out."""
    n, c_in, hh, ww = x_nchw.shape
    c_out = params["g1"].shape[0]

    # NCHW -> NHWC once at the block boundary; the (N*H, W*C) reshape is free.
    x2d = jnp.transpose(x_nchw, (0, 2, 3, 1)).reshape(n * hh, ww * c_in)
    x2d = x2d.astype(jnp.float32)

    # dy-merged banded conv weights, pre-cast to the MXU operand dtype.
    t1 = _row_toeplitz_dy_merged(params["w1"], ww).astype(matmul_dtype)
    t2 = _row_toeplitz_dy_merged(params["w2"], ww).astype(matmul_dtype)

    # Guard the O(W^2*C^2) banded-weight footprint (the first thing to blow
    # VMEM, hitting v7x's 64 MiB long before v5e/v6e's 128 MiB).
    w_bytes = t1.size * t1.dtype.itemsize + t2.size * t2.dtype.itemsize
    if w_bytes > 24 * 2**20:
        raise ValueError(
            f"banded conv weights need {w_bytes / 2**20:.1f} MiB of VMEM; "
            "switch to an im2col / row-tiled formulation for this size")

    # BN channel-fold matrix F[w*c + c', c'] = 1 and its transpose.
    eye = jnp.eye(c_out, dtype=jnp.float32)
    fold = jnp.kron(jnp.ones((ww, 1), jnp.float32), eye)     # (W*Cout, Cout)
    fold_t = jnp.kron(jnp.ones((1, ww), jnp.float32), eye)   # (Cout, W*Cout)

    g1 = params["g1"].reshape(1, c_out).astype(jnp.float32)
    g2 = params["g2"].reshape(1, c_out).astype(jnp.float32)
    # beta pre-tiled to the lane-interleaved (1, W*Cout) layout in the wrapper.
    bt1 = jnp.tile(params["beta1"].reshape(1, c_out).astype(jnp.float32), (1, ww))
    bt2 = jnp.tile(params["beta2"].reshape(1, c_out).astype(jnp.float32), (1, ww))
    # Conv biases b1/b2 cancel exactly under training-mode (batch-stat) BN and
    # are therefore not passed to the kernel.

    out_shape = jax.ShapeDtypeStruct((n * hh, ww * c_out), jnp.float32)

    # VMEM budget from the actual buffers (double-buffered IO + in-kernel f32
    # activation temporaries) with headroom; portable across 64/128 MiB chips.
    io_bytes = sum(int(a.size) * a.dtype.itemsize
                   for a in (x2d, t1, t2, fold, fold_t, g1, bt1, g2, bt2))
    io_bytes += int(np.prod(out_shape.shape)) * 4
    slab_bytes = n * hh * ww * max(c_in, c_out) * 4
    vmem_limit = min(int(2 * io_bytes + 16 * slab_bytes + (4 << 20)), 96 << 20)

    kernel = functools.partial(_conv_block_kernel, h=hh, w=ww, eps=eps,
                               mm_dtype=matmul_dtype)

    out2d = pl.pallas_call(
        kernel,
        out_shape=out_shape,
        grid=(1,),
        in_specs=[
            pl.BlockSpec((n * hh, ww * c_in), lambda i: (0, 0)),
            pl.BlockSpec(t1.shape, lambda i: (0, 0)),        # weights: constant
            pl.BlockSpec(t2.shape, lambda i: (0, 0)),        # index_map -> resident
            pl.BlockSpec(fold.shape, lambda i: (0, 0)),
            pl.BlockSpec(fold_t.shape, lambda i: (0, 0)),
            pl.BlockSpec((1, c_out), lambda i: (0, 0)),
            pl.BlockSpec((1, ww * c_out), lambda i: (0, 0)),
            pl.BlockSpec((1, c_out), lambda i: (0, 0)),
            pl.BlockSpec((1, ww * c_out), lambda i: (0, 0)),
        ],
        out_specs=pl.BlockSpec((n * hh, ww * c_out), lambda i: (0, 0)),
        compiler_params=pltpu.CompilerParams(
            dimension_semantics=("arbitrary",),
            vmem_limit_bytes=vmem_limit),
    )(x2d, t1, t2, fold, fold_t, g1, bt1, g2, bt2)

    # (N*H, W*Cout) -> NHWC (metadata-only) -> NCHW (interface glue).
    return jnp.transpose(out2d.reshape(n, hh, ww, c_out), (0, 3, 1, 2))


# ---------------------------------------------------------------------------
# Parameter init (PyTorch-like uniform fan-in bounds, weights kept in HWIO)
# ---------------------------------------------------------------------------
def init_conv_block_params(key, in_channels, out_channels):
    k1, k2, k3, k4 = jax.random.split(key, 4)

    def conv_init(kw, kb, cin, cout):
        bound = 1.0 / np.sqrt(cin * 3 * 3)
        w = jax.random.uniform(kw, (3, 3, cin, cout), jnp.float32, -bound, bound)
        b = jax.random.uniform(kb, (cout,), jnp.float32, -bound, bound)
        return w, b

    w1, b1 = conv_init(k1, k2, in_channels, out_channels)
    w2, b2 = conv_init(k3, k4, out_channels, out_channels)
    return dict(
        w1=w1, b1=b1, g1=jnp.ones((out_channels,), jnp.float32),
        beta1=jnp.zeros((out_channels,), jnp.float32),
        w2=w2, b2=b2, g2=jnp.ones((out_channels,), jnp.float32),
        beta2=jnp.zeros((out_channels,), jnp.float32),
    )


# ---------------------------------------------------------------------------
# Pure-JAX reference (independent path, full f32 precision)
# ---------------------------------------------------------------------------
def _ref_layer(x_nhwc, w_hwio, bias, gamma, beta, eps=1e-5):
    y = jax.lax.conv_general_dilated(
        x_nhwc, w_hwio, window_strides=(1, 1), padding="SAME",
        dimension_numbers=("NHWC", "HWIO", "NHWC"),
        precision=jax.lax.Precision.HIGHEST)
    y = y + bias[None, None, None, :]
    mean = jnp.mean(y, axis=(0, 1, 2))
    var = jnp.mean((y - mean) ** 2, axis=(0, 1, 2))   # biased, like PyTorch BN
    y = (y - mean) * jax.lax.rsqrt(var + eps) * gamma + beta
    return jnp.maximum(y, 0.0)


def _ref_forward(params, x_nchw):
    x = jnp.transpose(x_nchw, (0, 2, 3, 1))
    y = _ref_layer(x, params["w1"], params["b1"], params["g1"], params["beta1"])
    y = _ref_layer(y, params["w2"], params["b2"], params["g2"], params["beta2"])
    return jnp.transpose(y, (0, 3, 1, 2))


if __name__ == "__main__":
    key = jax.random.PRNGKey(0)
    k_params, k_x = jax.random.split(key)

    N, Cin, Cout, H, W = 2, 4, 8, 16, 16
    params = init_conv_block_params(k_params, Cin, Cout)
    x = jax.random.normal(k_x, (N, Cin, H, W), jnp.float32)   # NCHW like PyTorch

    ref = jax.block_until_ready(_ref_forward(params, x))

    # f32 MXU-operand path: tight check of the fused formulation.
    fwd_f32 = jax.jit(functools.partial(conv_block_forward,
                                        matmul_dtype=jnp.float32))
    out_f32 = jax.block_until_ready(fwd_f32(params, x))
    assert out_f32.shape == (N, Cout, H, W), out_f32.shape
    np.testing.assert_allclose(np.asarray(out_f32), np.asarray(ref),
                               rtol=1e-3, atol=1e-3)

    # Default bf16 MXU-operand path (f32 accumulation, f32 BN/ReLU math).
    fwd_bf16 = jax.jit(conv_block_forward)
    out_bf16 = jax.block_until_ready(fwd_bf16(params, x))
    assert out_bf16.shape == (N, Cout, H, W), out_bf16.shape
    np.testing.assert_allclose(np.asarray(out_bf16), np.asarray(ref),
                               rtol=5e-2, atol=5e-2)

    print("KERNEL_OK")
</pallas_src>

<mosaic_0001>
module attributes {stable_mosaic.version = 11 : i64} {
  func.func @_conv_block_kernel(%arg0: i32, %arg1: memref<32x64xf32, #tpu.memory_space<vmem>>, %arg2: memref<192x128xf32, #tpu.memory_space<vmem>>, %arg3: memref<384x128xf32, #tpu.memory_space<vmem>>, %arg4: memref<128x8xf32, #tpu.memory_space<vmem>>, %arg5: memref<8x128xf32, #tpu.memory_space<vmem>>, %arg6: memref<1x8xf32, #tpu.memory_space<vmem>>, %arg7: memref<1x128xf32, #tpu.memory_space<vmem>>, %arg8: memref<1x8xf32, #tpu.memory_space<vmem>>, %arg9: memref<1x128xf32, #tpu.memory_space<vmem>>, %arg10: memref<32x128xf32, #tpu.memory_space<vmem>>) attributes {dimension_semantics = [#tpu.dimension_semantics<arbitrary>], iteration_bounds = array<i64: 1>, scalar_prefetch = 0 : i64, scratch_operands = 0 : i64, tpu.core_type = #tpu.core_type<tc>, window_params = [{pipeline_mode = #tpu.pipeline_mode<synchronous>, transform_indices = @transform_0, window_bounds = array<i64: 32, 64>}, {pipeline_mode = #tpu.pipeline_mode<synchronous>, transform_indices = @transform_1, window_bounds = array<i64: 192, 128>}, {pipeline_mode = #tpu.pipeline_mode<synchronous>, transform_indices = @transform_2, window_bounds = array<i64: 384, 128>}, {pipeline_mode = #tpu.pipeline_mode<synchronous>, transform_indices = @transform_3, window_bounds = array<i64: 128, 8>}, {pipeline_mode = #tpu.pipeline_mode<synchronous>, transform_indices = @transform_4, window_bounds = array<i64: 8, 128>}, {pipeline_mode = #tpu.pipeline_mode<synchronous>, transform_indices = @transform_5, window_bounds = array<i64: 1, 8>}, {pipeline_mode = #tpu.pipeline_mode<synchronous>, transform_indices = @transform_6, window_bounds = array<i64: 1, 128>}, {pipeline_mode = #tpu.pipeline_mode<synchronous>, transform_indices = @transform_7, window_bounds = array<i64: 1, 8>}, {pipeline_mode = #tpu.pipeline_mode<synchronous>, transform_indices = @transform_8, window_bounds = array<i64: 1, 128>}, {pipeline_mode = #tpu.pipeline_mode<synchronous>, transform_indices = @transform_9, window_bounds = array<i64: 32, 128>}]} {
    %c0 = arith.constant 0 : index
    %c0_0 = arith.constant 0 : index
    %0 = vector.load %arg1[%c0, %c0_0] : memref<32x64xf32, #tpu.memory_space<vmem>>, vector<32x64xf32>
    %c0_1 = arith.constant 0 : index
    %c0_2 = arith.constant 0 : index
    %1 = vector.load %arg4[%c0_1, %c0_2] : memref<128x8xf32, #tpu.memory_space<vmem>>, vector<128x8xf32>
    %c0_3 = arith.constant 0 : index
    %c0_4 = arith.constant 0 : index
    %2 = vector.load %arg5[%c0_3, %c0_4] : memref<8x128xf32, #tpu.memory_space<vmem>>, vector<8x128xf32>
    %3 = tpu.iota {dimensions = array<i32: 0>} : vector<32x64xi32>
    %cst = arith.constant 0.000000e+00 : f32
    %4 = vector.broadcast %cst : f32 to vector<1x64xf32>
    %5 = vector.extract_strided_slice %0 {offsets = [0, 0], sizes = [31, 64], strides = [1, 1]} : vector<32x64xf32> to vector<31x64xf32>
    %6 = tpu.concatenate %4, %5 in 0 : vector<1x64xf32>, vector<31x64xf32> -> vector<32x64xf32>
    %c16_i32 = arith.constant 16 : i32
    %c0_i32 = arith.constant 0 : i32
    %7 = arith.cmpi eq, %c16_i32, %c0_i32 : i32
    %c1_i32 = arith.constant 1 : i32
    %8 = arith.select %7, %c1_i32, %c16_i32 : i32
    %9 = vector.broadcast %8 : i32 to vector<32x64xi32>
    %10 = arith.remsi %3, %9 : vector<32x64xi32>
    %c0_i32_5 = arith.constant 0 : i32
    %11 = vector.broadcast %c0_i32_5 : i32 to vector<32x64xi32>
    %12 = arith.cmpi ne, %10, %11 : vector<32x64xi32>
    %c0_i32_6 = arith.constant 0 : i32
    %13 = vector.broadcast %c0_i32_6 : i32 to vector<32x64xi32>
    %14 = arith.cmpi slt, %10, %13 : vector<32x64xi32>
    %c0_i32_7 = arith.constant 0 : i32
    %15 = arith.cmpi slt, %8, %c0_i32_7 : i32
    %16 = vector.broadcast %15 : i1 to vector<32x64xi1>
    %17 = vector.broadcast %16 : vector<32x64xi1> to vector<32x64xi1>
    %18 = arith.xori %14, %17 : vector<32x64xi1>
    %19 = arith.andi %18, %12 : vector<32x64xi1>
    %20 = vector.broadcast %8 : i32 to vector<32x64xi32>
    %21 = arith.addi %10, %20 : vector<32x64xi32>
    %22 = arith.select %19, %21, %10 : vector<32x64xi1>, vector<32x64xi32>
    %c0_i32_8 = arith.constant 0 : i32
    %23 = vector.broadcast %c0_i32_8 : i32 to vector<32x64xi32>
    %24 = arith.cmpi eq, %22, %23 : vector<32x64xi32>
    %cst_9 = arith.constant 0.000000e+00 : f32
    %25 = vector.broadcast %cst_9 : f32 to vector<32x64xf32>
    %26 = arith.select %24, %25, %6 : vector<32x64xi1>, vector<32x64xf32>
    %27 = vector.extract_strided_slice %0 {offsets = [1, 0], sizes = [31, 64], strides = [1, 1]} : vector<32x64xf32> to vector<31x64xf32>
    %28 = tpu.concatenate %27, %4 in 0 : vector<31x64xf32>, vector<1x64xf32> -> vector<32x64xf32>
    %c16_i32_10 = arith.constant 16 : i32
    %c0_i32_11 = arith.constant 0 : i32
    %29 = arith.cmpi eq, %c16_i32_10, %c0_i32_11 : i32
    %c1_i32_12 = arith.constant 1 : i32
    %30 = arith.select %29, %c1_i32_12, %c16_i32_10 : i32
    %31 = vector.broadcast %30 : i32 to vector<32x64xi32>
    %32 = arith.remsi %3, %31 : vector<32x64xi32>
    %c0_i32_13 = arith.constant 0 : i32
    %33 = vector.broadcast %c0_i32_13 : i32 to vector<32x64xi32>
    %34 = arith.cmpi ne, %32, %33 : vector<32x64xi32>
    %c0_i32_14 = arith.constant 0 : i32
    %35 = vector.broadcast %c0_i32_14 : i32 to vector<32x64xi32>
    %36 = arith.cmpi slt, %32, %35 : vector<32x64xi32>
    %c0_i32_15 = arith.constant 0 : i32
    %37 = arith.cmpi slt, %30, %c0_i32_15 : i32
    %38 = vector.broadcast %37 : i1 to vector<32x64xi1>
    %39 = vector.broadcast %38 : vector<32x64xi1> to vector<32x64xi1>
    %40 = arith.xori %36, %39 : vector<32x64xi1>
    %41 = arith.andi %40, %34 : vector<32x64xi1>
    %42 = vector.broadcast %30 : i32 to vector<32x64xi32>
    %43 = arith.addi %32, %42 : vector<32x64xi32>
    %44 = arith.select %41, %43, %32 : vector<32x64xi1>, vector<32x64xi32>
    %c15_i32 = arith.constant 15 : i32
    %45 = vector.broadcast %c15_i32 : i32 to vector<32x64xi32>
    %46 = arith.cmpi eq, %44, %45 : vector<32x64xi32>
    %cst_16 = arith.constant 0.000000e+00 : f32
    %47 = vector.broadcast %cst_16 : f32 to vector<32x64xf32>
    %48 = arith.select %46, %47, %28 : vector<32x64xi1>, vector<32x64xf32>
    %49 = tpu.concatenate %26, %0, %48 in 1 : vector<32x64xf32>, vector<32x64xf32>, vector<32x64xf32> -> vector<32x192xf32>
    %c0_17 = arith.constant 0 : index
    %c0_18 = arith.constant 0 : index
    %50 = vector.load %arg2[%c0_17, %c0_18] : memref<192x128xf32, #tpu.memory_space<vmem>>, vector<192x128xf32>
    %cst_19 = arith.constant dense<0.000000e+00> : vector<32x128xf32>
    %51 = tpu.matmul %49, %50, %cst_19 {dimension_numbers = #tpu.dot_dimension_numbers<[1], [0], [0], [1], [0, 0, 1, 1], [], []>} : vector<32x192xf32>, vector<192x128xf32>, vector<32x128xf32> -> vector<32x128xf32>
    %c0_20 = arith.constant 0 : index
    %c0_21 = arith.constant 0 : index
    %52 = vector.load %arg6[%c0_20, %c0_21] : memref<1x8xf32, #tpu.memory_space<vmem>>, vector<1x8xf32>
    %c0_22 = arith.constant 0 : index
    %c0_23 = arith.constant 0 : index
    %53 = vector.load %arg7[%c0_22, %c0_23] : memref<1x128xf32, #tpu.memory_space<vmem>>, vector<1x128xf32>
    %cst_24 = arith.constant dense<0.000000e+00> : vector<128xf32>
    %54 = vector.multi_reduction <add>, %51, %cst_24 [0] : vector<32x128xf32> to vector<128xf32>
    %55 = vector.shape_cast %54 : vector<128xf32> to vector<1x128xf32>
    %cst_25 = arith.constant dense<0.000000e+00> : vector<1x8xf32>
    %56 = tpu.matmul %55, %1, %cst_25 {dimension_numbers = #tpu.dot_dimension_numbers<[1], [0], [0], [1], [0, 0, 1, 1], [], []>} : vector<1x128xf32>, vector<128x8xf32>, vector<1x8xf32> -> vector<1x8xf32>
    %cst_26 = arith.constant 5.120000e+02 : f32
    %57 = vector.broadcast %cst_26 : f32 to vector<1x8xf32>
    %58 = arith.divf %56, %57 : vector<1x8xf32>
    %cst_27 = arith.constant dense<0.000000e+00> : vector<1x128xf32>
    %59 = tpu.matmul %58, %2, %cst_27 {dimension_numbers = #tpu.dot_dimension_numbers<[1], [0], [0], [1], [0, 0, 1, 1], [], []>} : vector<1x8xf32>, vector<8x128xf32>, vector<1x128xf32> -> vector<1x128xf32>
    %60 = vector.broadcast %59 : vector<1x128xf32> to vector<32x128xf32>
    %61 = arith.subf %51, %60 : vector<32x128xf32>
    %62 = arith.mulf %61, %61 : vector<32x128xf32>
    %cst_28 = arith.constant dense<0.000000e+00> : vector<128xf32>
    %63 = vector.multi_reduction <add>, %62, %cst_28 [0] : vector<32x128xf32> to vector<128xf32>
    %64 = vector.shape_cast %63 : vector<128xf32> to vector<1x128xf32>
    %cst_29 = arith.constant dense<0.000000e+00> : vector<1x8xf32>
    %65 = tpu.matmul %64, %1, %cst_29 {dimension_numbers = #tpu.dot_dimension_numbers<[1], [0], [0], [1], [0, 0, 1, 1], [], []>} : vector<1x128xf32>, vector<128x8xf32>, vector<1x8xf32> -> vector<1x8xf32>
    %cst_30 = arith.constant 5.120000e+02 : f32
    %66 = vector.broadcast %cst_30 : f32 to vector<1x8xf32>
    %67 = arith.divf %65, %66 : vector<1x8xf32>
    %cst_31 = arith.constant 9.99999974E-6 : f32
    %68 = vector.broadcast %cst_31 : f32 to vector<1x8xf32>
    %69 = arith.addf %67, %68 : vector<1x8xf32>
    %70 = math.rsqrt %69 : vector<1x8xf32>
    %71 = arith.mulf %52, %70 : vector<1x8xf32>
    %cst_32 = arith.constant dense<0.000000e+00> : vector<1x128xf32>
    %72 = tpu.matmul %71, %2, %cst_32 {dimension_numbers = #tpu.dot_dimension_numbers<[1], [0], [0], [1], [0, 0, 1, 1], [], []>} : vector<1x8xf32>, vector<8x128xf32>, vector<1x128xf32> -> vector<1x128xf32>
    %73 = vector.broadcast %72 : vector<1x128xf32> to vector<32x128xf32>
    %74 = arith.mulf %61, %73 : vector<32x128xf32>
    %75 = vector.broadcast %53 : vector<1x128xf32> to vector<32x128xf32>
    %76 = arith.addf %74, %75 : vector<32x128xf32>
    %cst_33 = arith.constant 0.000000e+00 : f32
    %77 = vector.broadcast %cst_33 : f32 to vector<32x128xf32>
    %78 = arith.maximumf %76, %77 : vector<32x128xf32>
    %79 = tpu.iota {dimensions = array<i32: 0>} : vector<32x128xi32>
    %cst_34 = arith.constant 0.000000e+00 : f32
    %80 = vector.broadcast %cst_34 : f32 to vector<1x128xf32>
    %81 = vector.extract_strided_slice %78 {offsets = [0, 0], sizes = [31, 128], strides = [1, 1]} : vector<32x128xf32> to vector<31x128xf32>
    %82 = tpu.concatenate %80, %81 in 0 : vector<1x128xf32>, vector<31x128xf32> -> vector<32x128xf32>
    %c16_i32_35 = arith.constant 16 : i32
    %c0_i32_36 = arith.constant 0 : i32
    %83 = arith.cmpi eq, %c16_i32_35, %c0_i32_36 : i32
    %c1_i32_37 = arith.constant 1 : i32
    %84 = arith.select %83, %c1_i32_37, %c16_i32_35 : i32
    %85 = vector.broadcast %84 : i32 to vector<32x128xi32>
    %86 = arith.remsi %79, %85 : vector<32x128xi32>
    %c0_i32_38 = arith.constant 0 : i32
    %87 = vector.broadcast %c0_i32_38 : i32 to vector<32x128xi32>
    %88 = arith.cmpi ne, %86, %87 : vector<32x128xi32>
    %c0_i32_39 = arith.constant 0 : i32
    %89 = vector.broadcast %c0_i32_39 : i32 to vector<32x128xi32>
    %90 = arith.cmpi slt, %86, %89 : vector<32x128xi32>
    %c0_i32_40 = arith.constant 0 : i32
    %91 = arith.cmpi slt, %84, %c0_i32_40 : i32
    %92 = vector.broadcast %91 : i1 to vector<32x128xi1>
    %93 = vector.broadcast %92 : vector<32x128xi1> to vector<32x128xi1>
    %94 = arith.xori %90, %93 : vector<32x128xi1>
    %95 = arith.andi %94, %88 : vector<32x128xi1>
    %96 = vector.broadcast %84 : i32 to vector<32x128xi32>
    %97 = arith.addi %86, %96 : vector<32x128xi32>
    %98 = arith.select %95, %97, %86 : vector<32x128xi1>, vector<32x128xi32>
    %c0_i32_41 = arith.constant 0 : i32
    %99 = vector.broadcast %c0_i32_41 : i32 to vector<32x128xi32>
    %100 = arith.cmpi eq, %98, %99 : vector<32x128xi32>
    %cst_42 = arith.constant 0.000000e+00 : f32
    %101 = vector.broadcast %cst_42 : f32 to vector<32x128xf32>
    %102 = arith.select %100, %101, %82 : vector<32x128xi1>, vector<32x128xf32>
    %103 = vector.extract_strided_slice %78 {offsets = [1, 0], sizes = [31, 128], strides = [1, 1]} : vector<32x128xf32> to vector<31x128xf32>
    %104 = tpu.concatenate %103, %80 in 0 : vector<31x128xf32>, vector<1x128xf32> -> vector<32x128xf32>
    %c16_i32_43 = arith.constant 16 : i32
    %c0_i32_44 = arith.constant 0 : i32
    %105 = arith.cmpi eq, %c16_i32_43, %c0_i32_44 : i32
    %c1_i32_45 = arith.constant 1 : i32
    %106 = arith.select %105, %c1_i32_45, %c16_i32_43 : i32
    %107 = vector.broadcast %106 : i32 to vector<32x128xi32>
    %108 = arith.remsi %79, %107 : vector<32x128xi32>
    %c0_i32_46 = arith.constant 0 : i32
    %109 = vector.broadcast %c0_i32_46 : i32 to vector<32x128xi32>
    %110 = arith.cmpi ne, %108, %109 : vector<32x128xi32>
    %c0_i32_47 = arith.constant 0 : i32
    %111 = vector.broadcast %c0_i32_47 : i32 to vector<32x128xi32>
    %112 = arith.cmpi slt, %108, %111 : vector<32x128xi32>
    %c0_i32_48 = arith.constant 0 : i32
    %113 = arith.cmpi slt, %106, %c0_i32_48 : i32
    %114 = vector.broadcast %113 : i1 to vector<32x128xi1>
    %115 = vector.broadcast %114 : vector<32x128xi1> to vector<32x128xi1>
    %116 = arith.xori %112, %115 : vector<32x128xi1>
    %117 = arith.andi %116, %110 : vector<32x128xi1>
    %118 = vector.broadcast %106 : i32 to vector<32x128xi32>
    %119 = arith.addi %108, %118 : vector<32x128xi32>
    %120 = arith.select %117, %119, %108 : vector<32x128xi1>, vector<32x128xi32>
    %c15_i32_49 = arith.constant 15 : i32
    %121 = vector.broadcast %c15_i32_49 : i32 to vector<32x128xi32>
    %122 = arith.cmpi eq, %120, %121 : vector<32x128xi32>
    %cst_50 = arith.constant 0.000000e+00 : f32
    %123 = vector.broadcast %cst_50 : f32 to vector<32x128xf32>
    %124 = arith.select %122, %123, %104 : vector<32x128xi1>, vector<32x128xf32>
    %125 = tpu.concatenate %102, %78, %124 in 1 : vector<32x128xf32>, vector<32x128xf32>, vector<32x128xf32> -> vector<32x384xf32>
    %c0_51 = arith.constant 0 : index
    %c0_52 = arith.constant 0 : index
    %126 = vector.load %arg3[%c0_51, %c0_52] : memref<384x128xf32, #tpu.memory_space<vmem>>, vector<384x128xf32>
    %cst_53 = arith.constant dense<0.000000e+00> : vector<32x128xf32>
    %127 = tpu.matmul %125, %126, %cst_53 {dimension_numbers = #tpu.dot_dimension_numbers<[1], [0], [0], [1], [0, 0, 1, 1], [], []>} : vector<32x384xf32>, vector<384x128xf32>, vector<32x128xf32> -> vector<32x128xf32>
    %c0_54 = arith.constant 0 : index
    %c0_55 = arith.constant 0 : index
    %128 = vector.load %arg8[%c0_54, %c0_55] : memref<1x8xf32, #tpu.memory_space<vmem>>, vector<1x8xf32>
    %c0_56 = arith.constant 0 : index
    %c0_57 = arith.constant 0 : index
    %129 = vector.load %arg9[%c0_56, %c0_57] : memref<1x128xf32, #tpu.memory_space<vmem>>, vector<1x128xf32>
    %cst_58 = arith.constant dense<0.000000e+00> : vector<128xf32>
    %130 = vector.multi_reduction <add>, %127, %cst_58 [0] : vector<32x128xf32> to vector<128xf32>
    %131 = vector.shape_cast %130 : vector<128xf32> to vector<1x128xf32>
    %cst_59 = arith.constant dense<0.000000e+00> : vector<1x8xf32>
    %132 = tpu.matmul %131, %1, %cst_59 {dimension_numbers = #tpu.dot_dimension_numbers<[1], [0], [0], [1], [0, 0, 1, 1], [], []>} : vector<1x128xf32>, vector<128x8xf32>, vector<1x8xf32> -> vector<1x8xf32>
    %cst_60 = arith.constant 5.120000e+02 : f32
    %133 = vector.broadcast %cst_60 : f32 to vector<1x8xf32>
    %134 = arith.divf %132, %133 : vector<1x8xf32>
    %cst_61 = arith.constant dense<0.000000e+00> : vector<1x128xf32>
    %135 = tpu.matmul %134, %2, %cst_61 {dimension_numbers = #tpu.dot_dimension_numbers<[1], [0], [0], [1], [0, 0, 1, 1], [], []>} : vector<1x8xf32>, vector<8x128xf32>, vector<1x128xf32> -> vector<1x128xf32>
    %136 = vector.broadcast %135 : vector<1x128xf32> to vector<32x128xf32>
    %137 = arith.subf %127, %136 : vector<32x128xf32>
    %138 = arith.mulf %137, %137 : vector<32x128xf32>
    %cst_62 = arith.constant dense<0.000000e+00> : vector<128xf32>
    %139 = vector.multi_reduction <add>, %138, %cst_62 [0] : vector<32x128xf32> to vector<128xf32>
    %140 = vector.shape_cast %139 : vector<128xf32> to vector<1x128xf32>
    %cst_63 = arith.constant dense<0.000000e+00> : vector<1x8xf32>
    %141 = tpu.matmul %140, %1, %cst_63 {dimension_numbers = #tpu.dot_dimension_numbers<[1], [0], [0], [1], [0, 0, 1, 1], [], []>} : vector<1x128xf32>, vector<128x8xf32>, vector<1x8xf32> -> vector<1x8xf32>
    %cst_64 = arith.constant 5.120000e+02 : f32
    %142 = vector.broadcast %cst_64 : f32 to vector<1x8xf32>
    %143 = arith.divf %141, %142 : vector<1x8xf32>
    %cst_65 = arith.constant 9.99999974E-6 : f32
    %144 = vector.broadcast %cst_65 : f32 to vector<1x8xf32>
    %145 = arith.addf %143, %144 : vector<1x8xf32>
    %146 = math.rsqrt %145 : vector<1x8xf32>
    %147 = arith.mulf %128, %146 : vector<1x8xf32>
    %cst_66 = arith.constant dense<0.000000e+00> : vector<1x128xf32>
    %148 = tpu.matmul %147, %2, %cst_66 {dimension_numbers = #tpu.dot_dimension_numbers<[1], [0], [0], [1], [0, 0, 1, 1], [], []>} : vector<1x8xf32>, vector<8x128xf32>, vector<1x128xf32> -> vector<1x128xf32>
    %149 = vector.broadcast %148 : vector<1x128xf32> to vector<32x128xf32>
    %150 = arith.mulf %137, %149 : vector<32x128xf32>
    %151 = vector.broadcast %129 : vector<1x128xf32> to vector<32x128xf32>
    %152 = arith.addf %150, %151 : vector<32x128xf32>
    %cst_67 = arith.constant 0.000000e+00 : f32
    %153 = vector.broadcast %cst_67 : f32 to vector<32x128xf32>
    %154 = arith.maximumf %152, %153 : vector<32x128xf32>
    %c0_68 = arith.constant 0 : index
    %c0_69 = arith.constant 0 : index
    %155 = vector.load %arg10[%c0_68, %c0_69] : memref<32x128xf32, #tpu.memory_space<vmem>>, vector<32x128xf32>
    tpu.vector_store %arg10[%c0_68, %c0_69], %154 {strides = array<i32>} : memref<32x128xf32, #tpu.memory_space<vmem>>, vector<32x128xf32>,
    return
  }
  func.func @transform_0(%arg0: i32) -> (i32, i32) {
    %c0_i32 = arith.constant 0 : i32
    %c0_i32_0 = arith.constant 0 : i32
    %c0_i32_1 = arith.constant 0 : i32
    return %c0_i32, %c0_i32_0 : i32, i32
  }
  func.func @transform_1(%arg0: i32) -> (i32, i32) {
    %c0_i32 = arith.constant 0 : i32
    %c0_i32_0 = arith.constant 0 : i32
    %c0_i32_1 = arith.constant 0 : i32
    return %c0_i32, %c0_i32_0 : i32, i32
  }
  func.func @transform_2(%arg0: i32) -> (i32, i32) {
    %c0_i32 = arith.constant 0 : i32
    %c0_i32_0 = arith.constant 0 : i32
    %c0_i32_1 = arith.constant 0 : i32
    return %c0_i32, %c0_i32_0 : i32, i32
  }
  func.func @transform_3(%arg0: i32) -> (i32, i32) {
    %c0_i32 = arith.constant 0 : i32
    %c0_i32_0 = arith.constant 0 : i32
    %c0_i32_1 = arith.constant 0 : i32
    return %c0_i32, %c0_i32_0 : i32, i32
  }
  func.func @transform_4(%arg0: i32) -> (i32, i32) {
    %c0_i32 = arith.constant 0 : i32
    %c0_i32_0 = arith.constant 0 : i32
    %c0_i32_1 = arith.constant 0 : i32
    return %c0_i32, %c0_i32_0 : i32, i32
  }
  func.func @transform_5(%arg0: i32) -> (i32, i32) {
    %c0_i32 = arith.constant 0 : i32
    %c0_i32_0 = arith.constant 0 : i32
    %c0_i32_1 = arith.constant 0 : i32
    return %c0_i32, %c0_i32_0 : i32, i32
  }
  func.func @transform_6(%arg0: i32) -> (i32, i32) {
    %c0_i32 = arith.constant 0 : i32
    %c0_i32_0 = arith.constant 0 : i32
    %c0_i32_1 = arith.constant 0 : i32
    return %c0_i32, %c0_i32_0 : i32, i32
  }
  func.func @transform_7(%arg0: i32) -> (i32, i32) {
    %c0_i32 = arith.constant 0 : i32
    %c0_i32_0 = arith.constant 0 : i32
    %c0_i32_1 = arith.constant 0 : i32
    return %c0_i32, %c0_i32_0 : i32, i32
  }
  func.func @transform_8(%arg0: i32) -> (i32, i32) {
    %c0_i32 = arith.constant 0 : i32
    %c0_i32_0 = arith.constant 0 : i32
    %c0_i32_1 = arith.constant 0 : i32
    return %c0_i32, %c0_i32_0 : i32, i32
  }
  func.func @transform_9(%arg0: i32) -> (i32, i32) {
    %c0_i32 = arith.constant 0 : i32
    %c0_i32_0 = arith.constant 0 : i32
    %c0_i32_1 = arith.constant 0 : i32
    return %c0_i32, %c0_i32_0 : i32, i32
  }
}

</mosaic_0001>

<bundles_post_ra>
// kernel: conv_block_forward.1
= control target key start
LH: loop header
LB: loop body
LE: loop exit
PB: predicated region body
PF: predicated region fallthrough
CT: control target
= control target key end

     0   :  { %s766_s13 = smov 64   ;;  %v53_v28 = vlaneseq  ;;  %vm164_vm0 = vcmask 523264   ;;  %vm131_vm1 = vcmask 1046528   ;;  %vm62_vm2 = vcmask 1040384   ;;  %s1345_s0 = inlined_call_operand.vmem [shape: f32[32,64], index: 0, kind: input, shape index: {}]   ;;  %s1346_s1 = inlined_call_operand.vmem [shape: f32[192,128], index: 1, kind: input, shape index: {}]   ;;  %s1347_s3 = inlined_call_operand.vmem [shape: f32[128,8], index: 3, kind: input, shape index: {}]   ;;  %s1348_s4 = inlined_call_operand.vmem [shape: f32[8,128], index: 4, kind: input, shape index: {}]   ;;  %s1349_s6 = inlined_call_operand.vmem [shape: f32[1,128], index: 6, kind: input, shape index: {}]   ;;  %s1350_s2 = inlined_call_operand.vmem [shape: f32[384,128], index: 2, kind: input, shape index: {}]   ;;  %s1351_s5 = inlined_call_operand.vmem [shape: f32[1,8], index: 5, kind: input, shape index: {}]   ;;  %s1352_s8 = inlined_call_operand.vmem [shape: f32[1,128], index: 8, kind: input, shape index: {}]   ;;  %s1353_s7 = inlined_call_operand.vmem [shape: f32[1,8], index: 7, kind: input, shape index: {}]   ;;  %s1354_s9 = inlined_call_operand.vmem [shape: f32[32,128], index: 9, kind: output, shape index: {}]  }
   0x1   :  { %v821_v0 = vld [vmem:[%s1345_s0] sm:$0xff]  ;;  %v826_v1 = vld [vmem:[%s1345_s0 + $0x10] sm:$0xff]  ;;  %v184_v2 = vld [vmem:[%s1346_s1 + $0x78] sm:$0xff]  ;;  %vm302_vm8 = vcmask 64512  }
   0x2   :  { %152 = vrot.lane.b32.xlu0 %v821_v0, %s766_s13  ;;  %156 = vrot.lane.b32.xlu1 %v826_v1, %s766_s13  ;;  %v183_v3 = vld [vmem:[%s1346_s1 + $0x70] sm:$0xff]  ;;  %v182_v4 = vld [vmem:[%s1346_s1 + $0x68] sm:$0xff]  ;;  %v132_v26 = vrot.slane %v821_v0, 1  ;;  %v54_v32 = vshrl.u32 %v53_v28, 7  ;;  %v135_v34 = vrot.slane %v826_v1, 1  ;;  %v63_v36 = vrot.slane %v821_v0, 7 }
   0x3   :  { %205 = vmatpush.msra.mxu0 %v184_v2  ;;  %v181_v5 = vld [vmem:[%s1346_s1 + $0x60] sm:$0xff]  ;;  %v192_v6 = vld [vmem:[%s1346_s1 + $0xb8] sm:$0xff]  ;;  %v191_v7 = vld [vmem:[%s1346_s1 + $0xb0] sm:$0xff]  ;;  %v66_v37 = vrot.slane %v826_v1, 7 }
   0x4   :  { %v851_v8 = vld [vmem:[%s1345_s0 + $0x8] sm:$0xff]  ;;  %v856_v9 = vld [vmem:[%s1345_s0 + $0x18] sm:$0xff]  ;;  %242 = vmatpush.msra.mxu1 %v192_v6  ;;  %v179_v12 = vld [vmem:[%s1346_s1 + $0x50] sm:$0xff]  ;;  %v55_v35 = vadd.s32 8, %v54_v32  ;;  %v57_v48 = vadd.s32 24, %v54_v32  ;;  %v79_v50 = vand.u32 15, %v54_v32 }
   0x5   :  { %206 = vmatpush.msra.mxu0 %v183_v3  ;;  %v180_v10 = vld [vmem:[%s1346_s1 + $0x58] sm:$0xff]  ;;  %v190_v11 = vld [vmem:[%s1346_s1 + $0xa8] sm:$0xff]  ;;  %v189_v13 = vld [vmem:[%s1346_s1 + $0xa0] sm:$0xff]  ;;  %v133_v27 = vrot.slane %v851_v8, 1  ;;  %v64_v33 = vrot.slane %v851_v8, 7  ;;  %v137_v44 = vrot.slane %v856_v9, 1 }
   0x6   :  { %243 = vmatpush.msra.mxu1 %v191_v7  ;;  %v178_v14 = vld [vmem:[%s1346_s1 + $0x48] sm:$0xff]  ;;  %v188_v15 = vld [vmem:[%s1346_s1 + $0x98] sm:$0xff]  ;;  %v177_v16 = vld [vmem:[%s1346_s1 + $0x40] sm:$0xff]  ;;  %v86_v38 = vand.u32 15, %v55_v35  ;;  %v68_v45 = vrot.slane %v856_v9, 7  ;;  %v100_v49 = vand.u32 15, %v57_v48 }
   0x7   :  { %207 = vmatpush.msra.mxu0 %v182_v4  ;;  %v187_v17 = vld [vmem:[%s1346_s1 + $0x90] sm:$0xff]  ;;  %v176_v18 = vld [vmem:[%s1346_s1 + $0x38] sm:$0xff]  ;;  %v186_v19 = vld [vmem:[%s1346_s1 + $0x88] sm:$0xff]  ;;  %v134_v31 = vsel %vm131_vm1, %v132_v26, %v133_v27  ;;  %v65_v39 = vsel %vm62_vm2, %v63_v36, %v64_v33  ;;  %v136_v40 = vsel %vm131_vm1, %v133_v27, %v135_v34  ;;  %v67_v43 = vsel %vm62_vm2, %v64_v33, %v66_v37 }
   0x8   :  { %244 = vmatpush.msra.mxu1 %v190_v11  ;;  %v175_v20 = vld [vmem:[%s1346_s1 + $0x30] sm:$0xff]  ;;  %v174_v21 = vld [vmem:[%s1346_s1 + $0x28] sm:$0xff]  ;;  %v173_v22 = vld [vmem:[%s1346_s1 + $0x20] sm:$0xff]  ;;  %vm924_vm3 = vcmp.eq.s32.totalorder %v86_v38, 15  ;;  %v138_v46 = vsel %vm131_vm1, %v135_v34, %v137_v44  ;;  %v69_v47 = vsel %vm62_vm2, %v66_v37, %v68_v45  ;;  %v143_v51 = vsel %vm131_vm1, %v137_v44, 0.0 }
   0x9   :  { %208 = vmatpush.msra.mxu0 %v181_v5  ;;  %v172_v23 = vld [vmem:[%s1346_s1 + $0x18] sm:$0xff]  ;;  %v171_v24 = vld [vmem:[%s1346_s1 + $0x10] sm:$0xff]  ;;  %v170_v25 = vld [vmem:[%s1346_s1 + $0x8] sm:$0xff]  ;;  %v149_v42 = vsel %vm924_vm3, 0.0, %v136_v40  ;;  %vm938_vm4 = vcmp.eq.s32.totalorder %v100_v49, 15  ;;  %v74_v54 = vsel %vm62_vm2, 0.0, %v63_v36 }
   0xa   :  { %154 = vrot.lane.b32.xlu0 %v851_v8, %s766_s13  ;;  %158 = vrot.lane.b32.xlu1 %v856_v9, %s766_s13  ;;  %v169_v29 = vld [vmem:[%s1346_s1] sm:$0xff]  ;;  %v151_v53 = vsel %vm938_vm4, 0.0, %v143_v51  ;;  %vm946_vm5 = vcmp.eq.s32.totalorder %v79_v50, 0  ;;  %v56_v59 = vadd.s32 16, %v54_v32  ;;  %v965_v5 = vld [vmem:[%s1347_s3 + $0x78] sm:$0xff]  ;;  %v767_v44 = vmov 512.0   ;;  %vm750_vm13 = vmneg %vm924_vm3 }
   0xb   :  { %209 = vmatpush.msra.mxu0 %v180_v10  ;;  %245 = vmatpush.msra.mxu1 %v189_v13  ;;  %v185_v30 = vld [vmem:[%s1346_s1 + $0x80] sm:$0xff]  ;;  %v127_v56 = vsel %vm946_vm5, 0.0, %v74_v54  ;;  %v971_v6 = vld [vmem:[%s1347_s3 + $0x70] sm:$0xff]  ;;  %v976_v7 = vld [vmem:[%s1347_s3 + $0x68] sm:$0xff]  ;;  %760 = vrcp.f32 %v767_v44 }
   0xc   :  { %v93_v60 = vand.u32 15, %v56_v59  ;;  %274 = vmatpush.msra.mxu2 %v965_v5  ;;  %v983_v8 = vld [vmem:[%s1347_s3 + $0x60] sm:$0xff]  ;;  %v989_v9 = vld [vmem:[%s1347_s3 + $0x58] sm:$0xff]  ;;  %v995_v10 = vld [vmem:[%s1347_s3 + $0x50] sm:$0xff] }
   0xd   :  { %210 = vmatpush.msra.mxu0 %v179_v12  ;;  %246 = vmatpush.msra.mxu1 %v188_v15  ;;  %v1000_v11 = vld [vmem:[%s1347_s3 + $0x48] sm:$0xff]  ;;  %v1007_v12 = vld [vmem:[%s1347_s3 + $0x40] sm:$0xff]  ;;  %v1019_v15 = vld [vmem:[%s1347_s3 + $0x30] sm:$0xff] }
   0xe   :  { %vm954_vm6 = vcmp.eq.s32.totalorder %v93_v60, 0  ;;  %275 = vmatpush.msra.mxu2 %v971_v6  ;;  %v495_v44 = vld [vmem:[%s1350_s2 + $0x158] sm:$0xff]  ;;  %vm746_vm12 = vmneg %vm946_vm5 }
   0xf   :  { %211 = vmatpush.msra.mxu0 %v178_v14  ;;  %247 = vmatpush.msra.mxu1 %v187_v17  ;;  %v129_v1 = vsel %vm954_vm6, 0.0, %v67_v43  ;;  %v1013_v14 = vld [vmem:[%s1347_s3 + $0x38] sm:$0xff]  ;;  %v1031_v17 = vld [vmem:[%s1347_s3 + $0x20] sm:$0xff]  ;;  %vm748_vm14 = vmneg %vm954_vm6 }
  0x10   :  { %276 = vmatpush.msra.mxu2 %v976_v7  ;;  %v1073_v43 = vld [vmem:[%s1348_s4] sm:$0xff]  ;;  %vm752_vm15 = vmneg %vm938_vm4 }
  0x11   :  { %212 = vmatpush.msra.mxu0 %v177_v16  ;;  %248 = vmatpush.msra.mxu1 %v186_v19  ;;  %v1025_v16 = vld [vmem:[%s1347_s3 + $0x28] sm:$0xff]  ;;  %v761_v45 = vpop.eup %760 }
  0x12   :  { %277 = vmatpush.msra.mxu2 %v983_v8  ;;  %321 = vmatpush.msra.mxu3 %v1073_v43  ;;  %vm299_vm7 = vweird.f32 %v761_v45 }
  0x13   :  { %213 = vmatpush.msra.mxu0 %v176_v18  ;;  %249 = vmatpush.msra.mxu1 %v185_v30  ;;  %v1036_v18 = vld [vmem:[%s1347_s3 + $0x18] sm:$0xff] }
  0x14   :  { %740 = vmatmul.msk.f32.vlgmr.msra.gmra.mxu1 %vm164_vm0, %v134_v31  ;;  %278 = vmatpush.msra.mxu2 %v989_v9 }
  0x15   :  { %214 = vmatpush.msra.mxu0 %v175_v20  ;;  %v1042_v20 = vld [vmem:[%s1347_s3 + $0x10] sm:$0xff]  ;;  %344 = vmatpush.msrb.mxu3 %v965_v5 }
  0x16   :  { %279 = vmatpush.msra.mxu2 %v995_v10 }
  0x17   :  { %215 = vmatpush.msra.mxu0 %v174_v21  ;;  %345 = vmatpush.msrb.mxu3 %v971_v6 }
  0x18   :  { %280 = vmatpush.msra.mxu2 %v1000_v11 }
  0x19   :  { %216 = vmatpush.msra.mxu0 %v173_v22  ;;  %v1048_v22 = vld [vmem:[%s1347_s3 + $0x8] sm:$0xff]  ;;  %346 = vmatpush.msrb.mxu3 %v976_v7 }
  0x1a   :  { %281 = vmatpush.msra.mxu2 %v1007_v12 }
  0x1b   :  { %217 = vmatpush.msra.mxu0 %v172_v23  ;;  %v1054_v23 = vld [vmem:[%s1347_s3] sm:$0xff]  ;;  %347 = vmatpush.msrb.mxu3 %v983_v8 }
  0x1c   :  { %741 = vmatmul.msk.f32.gmra.mxu1 %vm164_vm0, %v149_v42  ;;  %282 = vmatpush.msra.mxu2 %v1013_v14 }
  0x1d   :  { %218 = vmatpush.msra.mxu0 %v171_v24  ;;  %348 = vmatpush.msrb.mxu3 %v989_v9 }
  0x1e   :  { %283 = vmatpush.msra.mxu2 %v1019_v15 }
  0x1f   :  { %219 = vmatpush.msra.mxu0 %v170_v25  ;;  %349 = vmatpush.msrb.mxu3 %v995_v10 }
  0x20   :  { %284 = vmatpush.msra.mxu2 %v1025_v16 }
  0x21   :  { %220 = vmatpush.msra.mxu0 %v169_v29  ;;  %350 = vmatpush.msrb.mxu3 %v1000_v11 }
  0x22   :  { %285 = vmatpush.msra.mxu2 %v1031_v17 }
  0x23   :  { %351 = vmatpush.msrb.mxu3 %v1007_v12 }
  0x24   :  { %742 = vmatmul.msk.f32.gmra.mxu1 %vm164_vm0, %v138_v46  ;;  %286 = vmatpush.msra.mxu2 %v1036_v18  ;;  %v295_v46 = vmul.f32 512.0, %v761_v45 }
  0x25   :  { %352 = vmatpush.msrb.mxu3 %v1013_v14 }
  0x26   :  { %287 = vmatpush.msra.mxu2 %v1042_v20 }
  0x27   :  { %353 = vmatpush.msrb.mxu3 %v1019_v15 }
  0x28   :  { %288 = vmatpush.msra.mxu2 %v1048_v22 }
  0x29   :  { %354 = vmatpush.msrb.mxu3 %v1025_v16 }
  0x2a   :  { %289 = vmatpush.msra.mxu2 %v1054_v23 }
  0x2b   :  { %355 = vmatpush.msrb.mxu3 %v1031_v17 }
  0x2c   :  { %743 = vmatmul.msk.f32.gmra.mxu1 %vm164_vm0, %v151_v53  ;;  %395 = vmatpush.msrb.mxu2 %v1073_v43 }
  0x2d   :  { %356 = vmatpush.msrb.mxu3 %v1036_v18 }
  0x2f   :  { %357 = vmatpush.msrb.mxu3 %v1042_v20 }
  0x31   :  { %358 = vmatpush.msrb.mxu3 %v1048_v22 }
  0x33   :  { %359 = vmatpush.msrb.mxu3 %v1054_v23 }
  0x74   :  { %v153_v57 = vpop.permute.xlu0 %152  ;;  %v157_v0 = vpop.permute.xlu1 %156 }
  0x75   :  { %v165_v58 = vsel %vm164_vm0, %v127_v56, %v153_v57  ;;  %v167_v2 = vsel %vm164_vm0, %v129_v1, %v157_v0 }
  0x76   :  { %221 = vmatmul.f32.vlgmr.msra.gmra.mxu0 %v165_v58 }
  0x7c   :  { %v155_v61 = vpop.permute.xlu0 %154  ;;  %v159_v3 = vpop.permute.xlu1 %158 }
  0x7d   :  { %v166_v62 = vsel %vm164_vm0, %v65_v39, %v155_v61  ;;  %v168_v4 = vsel %vm164_vm0, %v69_v47, %v159_v3  ;;  %v296_v47 = vsub.f32 1.0, %v295_v46  ;;  %v478_v46 = vld [vmem:[%s1350_s2 + $0xd0] sm:$0xff] }
  0x7e   :  { %224 = vmatmul.f32.gmra.mxu0 %v166_v62 }
  0x7f   :  { %v297_v48 = vmul.f32 %v761_v45, %v296_v47  ;;  %v462_v47 = vld [vmem:[%s1350_s2 + $0x50] sm:$0xff] }
  0x81   :  { %v298_v49 = vadd.f32 %v761_v45, %v297_v48  ;;  %v494_v48 = vld [vmem:[%s1350_s2 + $0x150] sm:$0xff] }
  0x83   :  { %v1105_v50 = vsel %vm299_vm7, %v761_v45, %v298_v49 }
  0x86   :  { %227 = vmatmul.f32.gmra.mxu0 %v167_v2 }
  0x8e   :  { %230 = vmatmul.f32.gmra.mxu0 %v168_v4 }
  0x91   :  { %v251_v13 = vpop.f32.mrf.mxu1 }
  0x99   :  { %v254_v21 = vpop.f32.mrf.mxu1 }
  0xa1   :  { %v257_v25 = vpop.f32.mrf.mxu1 }
  0xa9   :  { %v260_v30 = vpop.f32.mrf.mxu1 }
  0xf3   :  { %v222_v19 = vpop.f32.mrf.mxu0 }
  0xf4   :  { %v1060_v28 = vadd.f32 %v251_v13, %v222_v19 }
  0xfb   :  { %v225_v24 = vpop.f32.mrf.mxu0 }
  0xfc   :  { %v1058_v27 = vadd.f32 %v254_v21, %v225_v24 }
  0xfe   :  { %v265_v31 = vadd.f32 %v1058_v27, %v1060_v28 }
 0x103   :  { %v228_v26 = vpop.f32.mrf.mxu0 }
 0x104   :  { %v1062_v29 = vadd.f32 %v257_v25, %v228_v26 }
 0x106   :  { %v266_v33 = vadd.f32 %v265_v31, %v1062_v29  ;;  %v466_v31 = vld [vmem:[%s1350_s2 + $0x70] sm:$0xff] }
 0x10b   :  { %v231_v32 = vpop.f32.mrf.mxu0 }
 0x10c   :  { %v1067_v34 = vadd.f32 %v260_v30, %v231_v32  ;;  %v499_v30 = vld [vmem:[%s1350_s2 + $0x178] sm:$0xff]  ;;  %v481_v32 = vld [vmem:[%s1350_s2 + $0xe8] sm:$0xff] }
 0x10e   :  { %v267_v35 = vadd.f32 %v266_v33, %v1067_v34  ;;  %v498_v33 = vld [vmem:[%s1350_s2 + $0x170] sm:$0xff] }
 0x110   :  { %v268_v36 = vrot.slane %v267_v35, 4 }
 0x112   :  { %v269_v37 = vadd.f32 %v268_v36, %v267_v35  ;;  %v497_v35 = vld [vmem:[%s1350_s2 + $0x168] sm:$0xff]  ;;  %v480_v36 = vld [vmem:[%s1350_s2 + $0xe0] sm:$0xff] }
 0x114   :  { %v270_v38 = vrot.slane %v269_v37, 2 }
 0x116   :  { %v271_v39 = vadd.f32 %v270_v38, %v269_v37  ;;  %v464_v37 = vld [vmem:[%s1350_s2 + $0x60] sm:$0xff] }
 0x117   :  { %v496_v38 = vld [vmem:[%s1350_s2 + $0x160] sm:$0xff] }
 0x118   :  { %v272_v40 = vrot.slane %v271_v39, 1 }
 0x11a   :  { %v273_v42 = vadd.f32 %v272_v40, %v271_v39  ;;  %v479_v39 = vld [vmem:[%s1350_s2 + $0xd8] sm:$0xff] }
 0x11b   :  { %v463_v40 = vld [vmem:[%s1350_s2 + $0x58] sm:$0xff] }
 0x11c   :  { %290 = vmatmul.f32.vlgmr.msra.gmra.mxu2 %v273_v42 }
 0x11d   :  { %598 = vmatpush.msra.mxu2 %v965_v5 }
 0x11f   :  { %599 = vmatpush.msra.mxu2 %v971_v6 }
 0x121   :  { %600 = vmatpush.msra.mxu2 %v976_v7 }
 0x123   :  { %601 = vmatpush.msra.mxu2 %v983_v8 }
 0x125   :  { %602 = vmatpush.msra.mxu2 %v989_v9 }
 0x127   :  { %603 = vmatpush.msra.mxu2 %v995_v10 }
 0x129   :  { %604 = vmatpush.msra.mxu2 %v1000_v11 }
 0x12b   :  { %605 = vmatpush.msra.mxu2 %v1007_v12 }
 0x12d   :  { %606 = vmatpush.msra.mxu2 %v1013_v14 }
 0x12f   :  { %607 = vmatpush.msra.mxu2 %v1019_v15 }
 0x131   :  { %608 = vmatpush.msra.mxu2 %v1025_v16 }
 0x133   :  { %609 = vmatpush.msra.mxu2 %v1031_v17 }
 0x135   :  { %610 = vmatpush.msra.mxu2 %v1036_v18 }
 0x137   :  { %611 = vmatpush.msra.mxu2 %v1042_v20 }
 0x139   :  { %612 = vmatpush.msra.mxu2 %v1048_v22 }
 0x13b   :  { %613 = vmatpush.msra.mxu2 %v1054_v23 }
 0x19f   :  { %v291_v51 = vpop.f32.mrf.mxu2 }
 0x1a0   :  { %v301_v53 = vmul.f32 %v1105_v50, %v291_v51  ;;  %v477_v51 = vld [vmem:[%s1350_s2 + $0xc8] sm:$0xff] }
 0x1a2   :  { %744 = vmatmul.msk.f32.vlgmr.msra.gmra.mxu3 %vm302_vm8, %v301_v53  ;;  %v461_v53 = vld [vmem:[%s1350_s2 + $0x48] sm:$0xff] }
 0x1a3   :  { %558 = vmatpush.msra.mxu3 %v499_v30 }
 0x1a5   :  { %559 = vmatpush.msra.mxu3 %v498_v33  ;;  %v457_v33 = vld [vmem:[%s1350_s2 + $0x28] sm:$0xff] }
 0x1a7   :  { %560 = vmatpush.msra.mxu3 %v497_v35  ;;  %v471_v35 = vld [vmem:[%s1350_s2 + $0x98] sm:$0xff] }
 0x1a9   :  { %561 = vmatpush.msra.mxu3 %v496_v38  ;;  %v470_v38 = vld [vmem:[%s1350_s2 + $0x90] sm:$0xff] }
 0x1ab   :  { %562 = vmatpush.msra.mxu3 %v495_v44  ;;  %v454_v44 = vld [vmem:[%s1350_s2 + $0x10] sm:$0xff] }
 0x1ad   :  { %563 = vmatpush.msra.mxu3 %v494_v48  ;;  %v485_v48 = vld [vmem:[%s1350_s2 + $0x108] sm:$0xff] }
 0x225   :  { %v323_v54 = vpop.f32.mrf.mxu3 }
 0x226   :  { %v326_v56 = vperm.slane %v323_v54, 0  ;;  %v493_v54 = vld [vmem:[%s1350_s2 + $0x148] sm:$0xff] }
 0x227   :  { %564 = vmatpush.msra.mxu3 %v493_v54 }
 0x228   :  { %v1114_v57 = vsub.f32 %v1060_v28, %v326_v56  ;;  %v1117_v58 = vsub.f32 %v1058_v27, %v326_v56  ;;  %v1120_v59 = vsub.f32 %v1062_v29, %v326_v56  ;;  %v1123_v60 = vsub.f32 %v1067_v34, %v326_v56  ;;  %v483_v27 = vld [vmem:[%s1350_s2 + $0xf8] sm:$0xff]  ;;  %v482_v28 = vld [vmem:[%s1350_s2 + $0xf0] sm:$0xff]  ;;  %v465_v34 = vld [vmem:[%s1350_s2 + $0x68] sm:$0xff] }
 0x229   :  { %v467_v29 = vld [vmem:[%s1350_s2 + $0x78] sm:$0xff]  ;;  %529 = vmatpush.msrb.mxu0 %v483_v27  ;;  %v476_v56 = vld [vmem:[%s1350_s2 + $0xc0] sm:$0xff] }
 0x22a   :  { %v331_v61 = vmul.f32 %v1114_v57, %v1114_v57  ;;  %v332_v62 = vmul.f32 %v1117_v58, %v1117_v58  ;;  %v333_v0 = vmul.f32 %v1120_v59, %v1120_v59  ;;  %v334_v2 = vmul.f32 %v1123_v60, %v1123_v60  ;;  %500 = vmatpush.msrb.mxu1 %v467_v29  ;;  %v263_v29 = vld [vmem:[%s1351_s5] sm:$0x1] }
 0x22b   :  { %530 = vmatpush.msrb.mxu0 %v482_v28 }
 0x22c   :  { %v335_v1 = vadd.f32 %v332_v62, %v331_v61  ;;  %501 = vmatpush.msrb.mxu1 %v466_v31  ;;  %v460_v61 = vld [vmem:[%s1350_s2 + $0x40] sm:$0xff] }
 0x22d   :  { %531 = vmatpush.msrb.mxu0 %v481_v32  ;;  %v492_v62 = vld [vmem:[%s1350_s2 + $0x140] sm:$0xff] }
 0x22e   :  { %v336_v3 = vadd.f32 %v335_v1, %v333_v0  ;;  %502 = vmatpush.msrb.mxu1 %v465_v34  ;;  %v475_v0 = vld [vmem:[%s1350_s2 + $0xb8] sm:$0xff]  ;;  %565 = vmatpush.msra.mxu3 %v492_v62  ;;  %v472_v32 = vld [vmem:[%s1350_s2 + $0xa0] sm:$0xff]  ;;  %v489_v34 = vld [vmem:[%s1350_s2 + $0x128] sm:$0xff] }
 0x22f   :  { %532 = vmatpush.msrb.mxu0 %v480_v36  ;;  %v459_v1 = vld [vmem:[%s1350_s2 + $0x38] sm:$0xff]  ;;  %v456_v36 = vld [vmem:[%s1350_s2 + $0x20] sm:$0xff] }
 0x230   :  { %v337_v4 = vadd.f32 %v336_v3, %v334_v2  ;;  %503 = vmatpush.msrb.mxu1 %v464_v37  ;;  %v491_v2 = vld [vmem:[%s1350_s2 + $0x138] sm:$0xff]  ;;  %v474_v3 = vld [vmem:[%s1350_s2 + $0xb0] sm:$0xff]  ;;  %v488_v37 = vld [vmem:[%s1350_s2 + $0x120] sm:$0xff] }
 0x231   :  { %533 = vmatpush.msrb.mxu0 %v479_v39  ;;  %566 = vmatpush.msra.mxu3 %v491_v2  ;;  %v455_v39 = vld [vmem:[%s1350_s2 + $0x18] sm:$0xff] }
 0x232   :  { %v338_v13 = vrot.slane %v337_v4, 4  ;;  %504 = vmatpush.msrb.mxu1 %v463_v40  ;;  %v487_v40 = vld [vmem:[%s1350_s2 + $0x118] sm:$0xff] }
 0x233   :  { %534 = vmatpush.msrb.mxu0 %v478_v46  ;;  %v468_v46 = vld [vmem:[%s1350_s2 + $0x80] sm:$0xff] }
 0x234   :  { %v339_v19 = vadd.f32 %v338_v13, %v337_v4  ;;  %505 = vmatpush.msrb.mxu1 %v462_v47  ;;  %v458_v4 = vld [vmem:[%s1350_s2 + $0x30] sm:$0xff]  ;;  %v453_v47 = vld [vmem:[%s1350_s2 + $0x8] sm:$0xff] }
 0x235   :  { %535 = vmatpush.msrb.mxu0 %v477_v51  ;;  %v490_v13 = vld [vmem:[%s1350_s2 + $0x130] sm:$0xff]  ;;  %v484_v51 = vld [vmem:[%s1350_s2 + $0x100] sm:$0xff] }
 0x236   :  { %v340_v21 = vrot.slane %v339_v19, 2  ;;  %506 = vmatpush.msrb.mxu1 %v461_v53  ;;  %567 = vmatpush.msra.mxu3 %v490_v13 }
 0x237   :  { %536 = vmatpush.msrb.mxu0 %v476_v56 }
 0x238   :  { %v341_v24 = vadd.f32 %v340_v21, %v339_v19  ;;  %507 = vmatpush.msrb.mxu1 %v460_v61  ;;  %v473_v21 = vld [vmem:[%s1350_s2 + $0xa8] sm:$0xff]  ;;  %568 = vmatpush.msra.mxu3 %v489_v34 }
 0x239   :  { %537 = vmatpush.msrb.mxu0 %v475_v0 }
 0x23a   :  { %v342_v25 = vrot.slane %v341_v24, 1  ;;  %508 = vmatpush.msrb.mxu1 %v459_v1  ;;  %569 = vmatpush.msra.mxu3 %v488_v37 }
 0x23b   :  { %538 = vmatpush.msrb.mxu0 %v474_v3 }
 0x23c   :  { %v343_v26 = vadd.f32 %v342_v25, %v341_v24  ;;  %509 = vmatpush.msrb.mxu1 %v458_v4  ;;  %570 = vmatpush.msra.mxu3 %v487_v40 }
 0x23d   :  { %539 = vmatpush.msrb.mxu0 %v473_v21 }
 0x23e   :  { %360 = vmatmul.f32.vlgmr.msrb.gmra.mxu3 %v343_v26  ;;  %510 = vmatpush.msrb.mxu1 %v457_v33 }
 0x23f   :  { %540 = vmatpush.msrb.mxu0 %v472_v32 }
 0x240   :  { %511 = vmatpush.msrb.mxu1 %v456_v36 }
 0x241   :  { %541 = vmatpush.msrb.mxu0 %v471_v35 }
 0x242   :  { %512 = vmatpush.msrb.mxu1 %v455_v39 }
 0x243   :  { %542 = vmatpush.msrb.mxu0 %v470_v38 }
 0x244   :  { %513 = vmatpush.msrb.mxu1 %v454_v44 }
 0x246   :  { %514 = vmatpush.msrb.mxu1 %v453_v47 }
 0x2c1   :  { %v361_v42 = vpop.f32.mrf.mxu3 }
 0x2c2   :  { %v364_v45 = vmul.f32 %v361_v42, %v1105_v50  ;;  %v469_v42 = vld [vmem:[%s1350_s2 + $0x88] sm:$0xff] }
 0x2c3   :  { %543 = vmatpush.msrb.mxu0 %v469_v42 }
 0x2c4   :  { %v365_v49 = vadd.f32 1e-05, %v364_v45  ;;  %v486_v45 = vld [vmem:[%s1350_s2 + $0x110] sm:$0xff] }
 0x2c5   :  { %571 = vmatpush.msra.mxu3 %v486_v45  ;;  %544 = vmatpush.msrb.mxu0 %v468_v46 }
 0x2c6   :  { %762 = vrsqrt.f32 %v365_v49  ;;  %vm372_vm10 = vweird.f32 %v365_v49 }
 0x2c7   :  { %572 = vmatpush.msra.mxu3 %v485_v48  ;;  %660 = vmatpush.msra.mxu0 %v965_v5 }
 0x2c9   :  { %573 = vmatpush.msra.mxu3 %v484_v51  ;;  %661 = vmatpush.msra.mxu0 %v971_v6 }
 0x2cb   :  { %662 = vmatpush.msra.mxu0 %v976_v7  ;;  %v758_v7 = vld [vmem:[%s1349_s6] ss:$0 sm:$0xff] }
 0x2cc   :  { %v763_v19 = vpop.eup %762 }
 0x2cd   :  { %v367_v24 = vmul.f32 %v763_v19, %v365_v49  ;;  %vm373_vm9 = vweird.f32 %v763_v19  ;;  %v452_v49 = vld [vmem:[%s1350_s2] sm:$0xff]  ;;  %663 = vmatpush.msra.mxu0 %v983_v8 }
 0x2ce   :  { %vm374_vm11 = vmor %vm372_vm10, %vm373_vm9  ;;  %515 = vmatpush.msrb.mxu1 %v452_v49 }
 0x2cf   :  { %v368_v25 = vmul.f32 %v763_v19, %v367_v24  ;;  %664 = vmatpush.msra.mxu0 %v989_v9 }
 0x2d0   :  { %637 = vmatpush.msra.mxu1 %v1073_v43 }
 0x2d1   :  { %v369_v26 = vmul.f32 0.5, %v368_v25  ;;  %665 = vmatpush.msra.mxu0 %v995_v10 }
 0x2d3   :  { %v370_v27 = vsub.f32 1.5, %v369_v26  ;;  %666 = vmatpush.msra.mxu0 %v1000_v11 }
 0x2d5   :  { %v371_v28 = vmul.f32 %v763_v19, %v370_v27  ;;  %667 = vmatpush.msra.mxu0 %v1007_v12 }
 0x2d7   :  { %v375_v30 = vsel %vm374_vm11, %v763_v19, %v371_v28  ;;  %668 = vmatpush.msra.mxu0 %v1013_v14 }
 0x2d8   :  { %v376_v31 = vmul.f32 %v375_v30, %v263_v29 }
 0x2d9   :  { %669 = vmatpush.msra.mxu0 %v1019_v15 }
 0x2da   :  { %745 = vmatmul.msk.f32.vlgmr.msrb.gmra.mxu2 %vm302_vm8, %v376_v31 }
 0x2db   :  { %711 = vmatpush.msrb.mxu2 %v1073_v43  ;;  %670 = vmatpush.msra.mxu0 %v1025_v16 }
 0x2dd   :  { %671 = vmatpush.msra.mxu0 %v1031_v17 }
 0x2df   :  { %672 = vmatpush.msra.mxu0 %v1036_v18 }
 0x2e1   :  { %673 = vmatpush.msra.mxu0 %v1042_v20 }
 0x2e3   :  { %674 = vmatpush.msra.mxu0 %v1048_v22 }
 0x2e5   :  { %675 = vmatpush.msra.mxu0 %v1054_v23 }
 0x35d   :  { %v397_v5 = vpop.f32.mrf.mxu2 }
 0x35e   :  { %v400_v6 = vperm.slane %v397_v5, 0 }
 0x360   :  { %v402_v8 = vmul.f32 %v400_v6, %v1117_v58  ;;  %v403_v9 = vmul.f32 %v400_v6, %v1120_v59  ;;  %v401_v10 = vmul.f32 %v400_v6, %v1114_v57  ;;  %v404_v57 = vmul.f32 %v400_v6, %v1123_v60 }
 0x362   :  { %v409_v11 = vadd.f32 %v758_v7, %v402_v8  ;;  %v408_v12 = vadd.f32 %v758_v7, %v401_v10  ;;  %v410_v14 = vadd.f32 %v758_v7, %v403_v9  ;;  %v411_v54 = vadd.f32 %v758_v7, %v404_v57 }
 0x364   :  { %v413_v15 = vmax.f32 %v409_v11, 0.0  ;;  %v412_v16 = vmax.f32 %v408_v12, 0.0  ;;  %v414_v59 = vmax.f32 %v410_v14, 0.0  ;;  %v415_v56 = vmax.f32 %v411_v54, 0.0 }
 0x366   :  { %545 = vmatmul.f32.vlgmr.msrb.gmra.mxu0 %v412_v16  ;;  %v420_v17 = vrot.slane %v412_v16, 7  ;;  %v436_v18 = vrot.slane %v412_v16, 1  ;;  %v437_v43 = vrot.slane %v413_v15, 1  ;;  %v421_v22 = vrot.slane %v413_v15, 7 }
 0x367   :  { %v439_v53 = vrot.slane %v414_v59, 1  ;;  %v423_v60 = vrot.slane %v414_v59, 7  ;;  %v441_v61 = vrot.slane %v415_v56, 1  ;;  %v425_v41 = vrot.slane %v415_v56, 7 }
 0x368   :  { %v431_v20 = vsel %vm62_vm2, 0.0, %v420_v17  ;;  %v438_v58 = vsel %vm131_vm1, %v436_v18, %v437_v43  ;;  %v422_v55 = vsel %vm62_vm2, %v420_v17, %v421_v22 }
 0x369   :  { %747 = vmatmul.msk.f32.vlgmr.msrb.gmra.mxu1 %vm746_vm12, %v431_v20  ;;  %574 = vmatmul.f32.vlgmr.msra.gmra.mxu3 %v438_v58  ;;  %v440_v23 = vsel %vm131_vm1, %v437_v43, %v439_v53  ;;  %v424_v62 = vsel %vm62_vm2, %v421_v22, %v423_v60  ;;  %v442_v0 = vsel %vm131_vm1, %v439_v53, %v441_v61  ;;  %v447_v2 = vsel %vm131_vm1, %v441_v61, 0.0 }
 0x36a   :  { %v426_v1 = vsel %vm62_vm2, %v423_v60, %v425_v41 }
 0x36e   :  { %548 = vmatmul.f32.gmra.mxu0 %v413_v15 }
 0x371   :  { %519 = vmatmul.f32.gmra.mxu1 %v422_v55  ;;  %751 = vmatmul.msk.f32.gmra.mxu3 %vm750_vm13, %v440_v23 }
 0x376   :  { %551 = vmatmul.f32.gmra.mxu0 %v414_v59 }
 0x379   :  { %749 = vmatmul.msk.f32.gmra.mxu1 %vm748_vm14, %v424_v62  ;;  %580 = vmatmul.f32.gmra.mxu3 %v442_v0  ;;  %v587_v62 = vld [vmem:[%s1353_s7] sm:$0x1] }
 0x37e   :  { %554 = vmatmul.f32.gmra.mxu0 %v415_v56 }
 0x381   :  { %525 = vmatmul.f32.gmra.mxu1 %v426_v1  ;;  %753 = vmatmul.msk.f32.gmra.mxu3 %vm752_vm15, %v447_v2 }
 0x3e3   :  { %v546_v3 = vpop.f32.mrf.mxu0 }
 0x3e6   :  { %v517_v63 = vpop.f32.mrf.mxu1 }
 0x3e7   :  { %v547_v28 = vadd.f32 %v546_v3, %v517_v63  ;;  %v759_v3 = vld [vmem:[%s1352_s8] ss:$0 sm:$0xff] }
 0x3eb   :  { %v549_v13 = vpop.f32.mrf.mxu0 }
 0x3ec   :  { %v575_v4 = vpop.f32.mrf.mxu3 }
 0x3ed   :  { %v576_v31 = vadd.f32 %v575_v4, %v547_v28 }
 0x3ee   :  { %v520_v19 = vpop.f32.mrf.mxu1 }
 0x3ef   :  { %v550_v27 = vadd.f32 %v549_v13, %v520_v19 }
 0x3f3   :  { %v552_v25 = vpop.f32.mrf.mxu0 }
 0x3f4   :  { %v578_v21 = vpop.f32.mrf.mxu3 }
 0x3f5   :  { %v579_v29 = vadd.f32 %v578_v21, %v550_v27 }
 0x3f6   :  { %v523_v24 = vpop.f32.mrf.mxu1 }
 0x3f7   :  { %v553_v52 = vadd.f32 %v552_v25, %v523_v24  ;;  %v589_v34 = vadd.f32 %v579_v29, %v576_v31 }
 0x3fb   :  { %v555_v33 = vpop.f32.mrf.mxu0 }
 0x3fc   :  { %v581_v26 = vpop.f32.mrf.mxu3 }
 0x3fd   :  { %v582_v32 = vadd.f32 %v581_v26, %v553_v52 }
 0x3fe   :  { %v526_v30 = vpop.f32.mrf.mxu1 }
 0x3ff   :  { %v556_v35 = vadd.f32 %v555_v33, %v526_v30  ;;  %v590_v37 = vadd.f32 %v589_v34, %v582_v32 }
 0x404   :  { %v584_v36 = vpop.f32.mrf.mxu3 }
 0x405   :  { %v585_v38 = vadd.f32 %v584_v36, %v556_v35 }
 0x407   :  { %v591_v39 = vadd.f32 %v590_v37, %v585_v38 }
 0x409   :  { %v592_v40 = vrot.slane %v591_v39, 4 }
 0x40b   :  { %v593_v42 = vadd.f32 %v592_v40, %v591_v39 }
 0x40d   :  { %v594_v44 = vrot.slane %v593_v42, 2 }
 0x40f   :  { %v595_v45 = vadd.f32 %v594_v44, %v593_v42 }
 0x411   :  { %v596_v46 = vrot.slane %v595_v45, 1 }
 0x413   :  { %v597_v47 = vadd.f32 %v596_v46, %v595_v45 }
 0x415   :  { %614 = vmatmul.f32.vlgmr.msra.gmra.mxu2 %v597_v47 }
 0x498   :  { %v615_v48 = vpop.f32.mrf.mxu2 }
 0x499   :  { %v618_v49 = vmul.f32 %v615_v48, %v1105_v50 }
 0x49b   :  { %754 = vmatmul.msk.f32.vlgmr.msra.gmra.mxu1 %vm302_vm8, %v618_v49 }
 0x518   :  { %v639_v51 = vpop.f32.mrf.mxu1 }
 0x519   :  { %v642_v5 = vperm.slane %v639_v51, 0 }
 0x51b   :  { %v643_v6 = vsub.f32 %v576_v31, %v642_v5  ;;  %v644_v7 = vsub.f32 %v579_v29, %v642_v5  ;;  %v645_v8 = vsub.f32 %v582_v32, %v642_v5  ;;  %v646_v9 = vsub.f32 %v585_v38, %v642_v5 }
 0x51d   :  { %v647_v10 = vmul.f32 %v643_v6, %v643_v6  ;;  %v648_v11 = vmul.f32 %v644_v7, %v644_v7  ;;  %v649_v12 = vmul.f32 %v645_v8, %v645_v8  ;;  %v650_v15 = vmul.f32 %v646_v9, %v646_v9 }
 0x51f   :  { %v651_v14 = vadd.f32 %v648_v11, %v647_v10 }
 0x521   :  { %v652_v16 = vadd.f32 %v651_v14, %v649_v12 }
 0x523   :  { %v653_v17 = vadd.f32 %v652_v16, %v650_v15 }
 0x525   :  { %v654_v18 = vrot.slane %v653_v17, 4 }
 0x527   :  { %v655_v43 = vadd.f32 %v654_v18, %v653_v17 }
 0x529   :  { %v656_v57 = vrot.slane %v655_v43, 2 }
 0x52b   :  { %v657_v20 = vadd.f32 %v656_v57, %v655_v43 }
 0x52d   :  { %v658_v58 = vrot.slane %v657_v20, 1 }
 0x52f   :  { %v659_v59 = vadd.f32 %v658_v58, %v657_v20 }
 0x531   :  { %676 = vmatmul.f32.vlgmr.msra.gmra.mxu0 %v659_v59 }
 0x5ae   :  { %v677_v22 = vpop.f32.mrf.mxu0 }
 0x5af   :  { %v680_v53 = vmul.f32 %v677_v22, %v1105_v50 }
 0x5b1   :  { %v681_v54 = vadd.f32 1e-05, %v680_v53 }
 0x5b3   :  { %764 = vrsqrt.f32 %v681_v54  ;;  %vm688_vm1 = vweird.f32 %v681_v54 }
 0x5b9   :  { %v765_v55 = vpop.eup %764 }
 0x5ba   :  { %v683_v23 = vmul.f32 %v765_v55, %v681_v54  ;;  %vm689_vm0 = vweird.f32 %v765_v55 }
 0x5bb   :  { %vm690_vm2 = vmor %vm688_vm1, %vm689_vm0 }
 0x5bc   :  { %v684_v56 = vmul.f32 %v765_v55, %v683_v23 }
 0x5be   :  { %v685_v60 = vmul.f32 0.5, %v684_v56 }
 0x5c0   :  { %v686_v61 = vsub.f32 1.5, %v685_v60 }
 0x5c2   :  { %v687_v0 = vmul.f32 %v765_v55, %v686_v61 }
 0x5c4   :  { %v691_v41 = vsel %vm690_vm2, %v765_v55, %v687_v0 }
 0x5c5   :  { %v692_v1 = vmul.f32 %v691_v41, %v587_v62 }
 0x5c7   :  { %755 = vmatmul.msk.f32.vlgmr.msrb.gmra.mxu2 %vm302_vm8, %v692_v1 }
 0x64a   :  { %v713_v50 = vpop.f32.mrf.mxu2 }
 0x64b   :  { %v716_v2 = vperm.slane %v713_v50, 0 }
 0x64d   :  { %v717_v63 = vmul.f32 %v716_v2, %v643_v6  ;;  %v718_v4 = vmul.f32 %v716_v2, %v644_v7  ;;  %v719_v13 = vmul.f32 %v716_v2, %v645_v8  ;;  %v720_v19 = vmul.f32 %v716_v2, %v646_v9 }
 0x64f   :  { %v724_v21 = vadd.f32 %v759_v3, %v717_v63  ;;  %v725_v24 = vadd.f32 %v759_v3, %v718_v4  ;;  %v726_v25 = vadd.f32 %v759_v3, %v719_v13  ;;  %v727_v26 = vadd.f32 %v759_v3, %v720_v19 }
 0x651   :  { %v728_v27 = vmax.f32 %v724_v21, 0.0  ;;  %v729_v28 = vmax.f32 %v725_v24, 0.0  ;;  %v730_v29 = vmax.f32 %v726_v25, 0.0  ;;  %v731_v52 = vmax.f32 %v727_v26, 0.0 }
 0x653   :  { %732 = vst [vmem:[%s1354_s9] sm:$0xff] %v728_v27 }
 0x654   :  { %733 = vst [vmem:[%s1354_s9 + $0x8] sm:$0xff] %v729_v28 }
 0x655   :  { %734 = vst [vmem:[%s1354_s9 + $0x10] sm:$0xff] %v730_v29 }
 0x656   :  { %735 = vst [vmem:[%s1354_s9 + $0x18] sm:$0xff] %v731_v52 }

</bundles_post_ra>
